<compile_context>
chip_gen: v6e
topology: v6e:2x2x1
jax: 0.10.0
libtpu: 0.0.40
codegen_flags: <defaults>
</compile_context>

<pallas_src>
import functools

import jax
import jax.numpy as jnp
from jax import lax
from jax.experimental import pallas as pl
from jax.experimental.pallas import tpu as pltpu


def _proto_cosine_kernel(x_ref, p_ref, xnorm_ref, pnorm_ref, o_ref, acc_ref,
                         *, approx_recip):
    """Accumulate one (TM, TN) tile of x @ p.T over the K grid axis; normalize
    into cosine similarity on the last K step."""
    k = pl.program_id(2)

    @pl.when(k == 0)
    def _init():
        acc_ref[...] = jnp.zeros_like(acc_ref)

    # MXU: contract over the feature chunk with both operands in (rows, K)
    # layout -> no in-kernel transpose/relayout; f32 accumulation.
    acc_ref[...] += lax.dot_general(
        x_ref[...], p_ref[...],
        dimension_numbers=(((1,), (1,)), ((), ())),
        preferred_element_type=jnp.float32,
    )

    @pl.when(k == pl.num_programs(2) - 1)
    def _epilogue():
        # denom[b, c] = ||x_b|| * ||p_c|| + 1e-8 (same eps placement as ref).
        denom = xnorm_ref[...] * pnorm_ref[...] + 1e-8        # (TM, TN) f32
        if approx_recip:
            inv = pl.reciprocal(denom, approx=True)           # EUP, ~2^-12 rel
        else:
            inv = 1.0 / denom
        o_ref[...] = (acc_ref[...] * inv).astype(o_ref.dtype)


def _round_up(v, m):
    return (v + m - 1) // m * m


def _vmem_ceiling_bytes():
    """Generation-aware ceiling for vmem_limit_bytes."""
    try:
        kind = jax.devices()[0].device_kind.lower()
    except Exception:
        kind = ""
    if "v5" in kind or "v6" in kind:
        return 100 << 20          # 128 MiB physical VMEM on v5e/v6e
    return 48 << 20               # v7x has 64 MiB; stay conservative on unknown


def _tile_footprint_bytes(tm, tn, tk, op_bytes):
    # Double-buffered x/proto operand tiles + double-buffered f32 output tile
    # + f32 accumulator scratch + (tiny) norm blocks.
    return (2 * (tm + tn) * tk * op_bytes
            + 3 * tm * tn * 4
            + 2 * (tm + tn) * 4)


def _choose_tiles(b_rows, c_rows, d_cols, op_bytes, vmem_ceiling):
    """Pick (TM, TN, TK). b_rows/c_rows/d_cols already rounded to (8,128,128)."""
    budget = min(vmem_ceiling - (8 << 20), 64 << 20)
    tm_cap = 512 if vmem_ceiling > (64 << 20) else 256

    # Keep the whole feature dim resident when it is small; otherwise cap the
    # reduction tile so VMEM stays bounded independent of D.
    tk = d_cols if d_cols <= 2048 else 1024

    # Prefer a class tile covering every prototype (the prototype matrix and
    # its norms are then DMA'd from HBM exactly once, only x tiles stream);
    # otherwise fall back to lane-dense chunks.
    for tn in (c_rows, 512, 256, 128):
        if tn > c_rows or tn % 128:
            continue
        tm = min(tm_cap, b_rows)
        while tm > 8 and _tile_footprint_bytes(tm, tn, tk, op_bytes) > budget:
            tm //= 2
        tm = max(8, tm - tm % 8)
        if _tile_footprint_bytes(tm, tn, tk, op_bytes) <= budget:
            return tm, tn, tk
    # Last resort for extreme D / tiny budgets: shrink the reduction tile too.
    return 8, 128, min(tk, 512)


def prototype_model_forward(x, prototypes, *, compute_dtype=None,
                            approx_reciprocal=True):
    """Cosine-similarity prototype scores.

    x:          (B, ...) input batch (flattened over all non-batch dims).
    prototypes: (num_classes, D) class-prototype matrix ({j: proto_j} stacked).
    compute_dtype: dtype the MXU operands are streamed in (jnp.bfloat16 halves
        HBM traffic, ~1e-2 relative error). None keeps the input dtype.
        Norms and the epilogue always run in float32.
    Returns float32 (B, num_classes).
    """
    B = x.shape[0]
    x_flat = x.reshape(B, -1)                     # glue: flatten in plain JAX
    num_classes, D = prototypes.shape
    assert x_flat.shape[1] == D, "prototype dim must match flattened input"

    op_dtype = jnp.dtype(compute_dtype) if compute_dtype is not None else x_flat.dtype
    op_bytes = jnp.dtype(op_dtype).itemsize

    vmem_ceiling = _vmem_ceiling_bytes()
    b_rows = _round_up(B, 8)
    c_rows = _round_up(num_classes, 128)
    d_cols = _round_up(D, 128)
    TM, TN, TK = _choose_tiles(b_rows, c_rows, d_cols, op_bytes, vmem_ceiling)

    # Megacore (v7x has 2 TensorCores): if the whole batch fits one tile,
    # split the class axis into >=2 parallel blocks so both cores get work.
    if b_rows <= TM and TN >= c_rows and c_rows > 128:
        TN = max(128, _round_up(c_rows // 2, 128))

    B_pad = _round_up(B, TM)
    C_pad = _round_up(num_classes, TN)
    D_pad = _round_up(D, TK)

    # Batch/class-invariant L2 norms computed once here (f32), never in the
    # kernel. Zero-padded rows/cols -> norm 0 -> denom = eps -> score 0; the
    # padded region is sliced off before returning.
    x_norm = jnp.sqrt(jnp.sum(x_flat.astype(jnp.float32) ** 2, axis=-1,
                              keepdims=True))                       # (B, 1)
    p_norm = jnp.sqrt(jnp.sum(prototypes.astype(jnp.float32) ** 2, axis=-1,
                              keepdims=True)).T                     # (1, C)

    x_op = jnp.pad(x_flat.astype(op_dtype), ((0, B_pad - B), (0, D_pad - D)))
    p_op = jnp.pad(prototypes.astype(op_dtype),
                   ((0, C_pad - num_classes), (0, D_pad - D)))
    x_norm = jnp.pad(x_norm, ((0, B_pad - B), (0, 0)))
    p_norm = jnp.pad(p_norm, ((0, 0), (0, C_pad - num_classes)))

    grid = (B_pad // TM, C_pad // TN, D_pad // TK)

    vmem_limit = int(min(vmem_ceiling,
                         max(2 * _tile_footprint_bytes(TM, TN, TK, op_bytes),
                             32 << 20)))

    kernel = functools.partial(_proto_cosine_kernel,
                               approx_recip=approx_reciprocal)

    scores = pl.pallas_call(
        kernel,
        out_shape=jax.ShapeDtypeStruct((B_pad, C_pad), jnp.float32),
        grid_spec=pltpu.PrefetchScalarGridSpec(
            num_scalar_prefetch=0,
            grid=grid,
            in_specs=[
                pl.BlockSpec((TM, TK), lambda i, j, k: (i, k)),   # x tile
                # TODO(synk): sweep pipeline_mode=pl.Buffered(3) on the
                # prototype stream when VMEM headroom exists.
                pl.BlockSpec((TN, TK), lambda i, j, k: (j, k)),   # prototype tile
                pl.BlockSpec((TM, 1), lambda i, j, k: (i, 0)),    # ||x_b||
                pl.BlockSpec((1, TN), lambda i, j, k: (0, j)),    # ||p_c||
            ],
            out_specs=pl.BlockSpec((TM, TN), lambda i, j, k: (i, j)),
            scratch_shapes=[pltpu.VMEM((TM, TN), jnp.float32)],
        ),
        compiler_params=pltpu.CompilerParams(
            dimension_semantics=("parallel", "parallel", "arbitrary"),
            vmem_limit_bytes=vmem_limit,
        ),
    )(x_op, p_op, x_norm, p_norm)

    return scores[:B, :num_classes]


if __name__ == "__main__":
    key = jax.random.PRNGKey(0)
    k_x, k_p = jax.random.split(key)

    # Input consistent with an NCHW image batch: (batch=2, channels=4, 16, 16)
    B, C_in, H, W = 2, 4, 16, 16
    D = C_in * H * W
    num_classes = 8

    x = jax.random.normal(k_x, (B, C_in, H, W), dtype=jnp.float32)
    # Deterministic "class prototypes" (the dict {j: proto_j} as a (C, D) matrix).
    prototypes = jax.random.normal(k_p, (num_classes, D), dtype=jnp.float32)

    scores = prototype_model_forward(x, prototypes)
    scores = jax.block_until_ready(scores)

    # Pure-JAX reference (tolerance covers the EUP approx-reciprocal, ~2^-12).
    x_flat = x.reshape(B, -1)
    ref = (x_flat @ prototypes.T) / (
        jnp.linalg.norm(x_flat, axis=-1, keepdims=True)
        * jnp.linalg.norm(prototypes, axis=-1, keepdims=True).T
        + 1e-8
    )
    assert scores.shape == (B, num_classes)
    assert scores.dtype == jnp.float32
    assert jnp.allclose(scores, ref, atol=1e-4, rtol=1e-3)

    # bf16 streaming path (halves HBM traffic on the mem-bound side); looser
    # tolerance per the expected ~1e-2 relative error from bf16 operands.
    scores_bf16 = jax.block_until_ready(
        prototype_model_forward(x, prototypes, compute_dtype=jnp.bfloat16))
    assert jnp.allclose(scores_bf16, ref, atol=5e-2)

    print("KERNEL_OK")
</pallas_src>

<mosaic_0001>
module attributes {stable_mosaic.version = 11 : i64} {
  func.func @_proto_cosine_kernel(%arg0: i32, %arg1: i32, %arg2: i32, %arg3: memref<8x1024xf32, #tpu.memory_space<vmem>>, %arg4: memref<128x1024xf32, #tpu.memory_space<vmem>>, %arg5: memref<8x1xf32, #tpu.memory_space<vmem>>, %arg6: memref<1x128xf32, #tpu.memory_space<vmem>>, %arg7: memref<8x128xf32, #tpu.memory_space<vmem>>, %arg8: memref<8x128xf32, #tpu.memory_space<vmem>>) attributes {dimension_semantics = [#tpu.dimension_semantics<parallel>, #tpu.dimension_semantics<parallel>, #tpu.dimension_semantics<arbitrary>], iteration_bounds = array<i64: 1, 1, 1>, scalar_prefetch = 0 : i64, scratch_operands = 1 : i64, tpu.core_type = #tpu.core_type<tc>, window_params = [{transform_indices = @transform_0, window_bounds = array<i64: 8, 1024>}, {transform_indices = @transform_1, window_bounds = array<i64: 128, 1024>}, {transform_indices = @transform_2, window_bounds = array<i64: 8, 1>}, {transform_indices = @transform_3, window_bounds = array<i64: 1, 128>}, {transform_indices = @transform_4, window_bounds = array<i64: 8, 128>}]} {
    %c0_i32 = arith.constant 0 : i32
    %0 = arith.cmpi eq, %arg2, %c0_i32 : i32
    %1 = arith.extui %0 : i1 to i32
    %c0_i32_0 = arith.constant 0 : i32
    %2 = arith.cmpi ne, %1, %c0_i32_0 : i32
    scf.if %2 {
      %cst_10 = arith.constant 0.000000e+00 : f32
      %12 = vector.broadcast %cst_10 : f32 to vector<8x128xf32>
      %c0_11 = arith.constant 0 : index
      %c0_12 = arith.constant 0 : index
      %13 = vector.load %arg8[%c0_11, %c0_12] : memref<8x128xf32, #tpu.memory_space<vmem>>, vector<8x128xf32>
      tpu.vector_store %arg8[%c0_11, %c0_12], %12 {strides = array<i32>} : memref<8x128xf32, #tpu.memory_space<vmem>>, vector<8x128xf32>,
    } else {
    }
    %c0 = arith.constant 0 : index
    %c0_1 = arith.constant 0 : index
    %3 = vector.load %arg8[%c0, %c0_1] : memref<8x128xf32, #tpu.memory_space<vmem>>, vector<8x128xf32>
    %c0_2 = arith.constant 0 : index
    %c0_3 = arith.constant 0 : index
    %4 = vector.load %arg3[%c0_2, %c0_3] : memref<8x1024xf32, #tpu.memory_space<vmem>>, vector<8x1024xf32>
    %c0_4 = arith.constant 0 : index
    %c0_5 = arith.constant 0 : index
    %5 = vector.load %arg4[%c0_4, %c0_5] : memref<128x1024xf32, #tpu.memory_space<vmem>>, vector<128x1024xf32>
    %cst = arith.constant dense<0.000000e+00> : vector<8x128xf32>
    %6 = tpu.matmul %4, %5, %cst {dimension_numbers = #tpu.dot_dimension_numbers<[1], [1], [0], [0], [0, 0, 1, 0], [], []>} : vector<8x1024xf32>, vector<128x1024xf32>, vector<8x128xf32> -> vector<8x128xf32>
    %7 = arith.addf %3, %6 : vector<8x128xf32>
    %c0_6 = arith.constant 0 : index
    %c0_7 = arith.constant 0 : index
    %8 = vector.load %arg8[%c0_6, %c0_7] : memref<8x128xf32, #tpu.memory_space<vmem>>, vector<8x128xf32>
    tpu.vector_store %arg8[%c0_6, %c0_7], %7 {strides = array<i32>} : memref<8x128xf32, #tpu.memory_space<vmem>>, vector<8x128xf32>,
    %c0_i32_8 = arith.constant 0 : i32
    %9 = arith.cmpi eq, %arg2, %c0_i32_8 : i32
    %10 = arith.extui %9 : i1 to i32
    %c0_i32_9 = arith.constant 0 : i32
    %11 = arith.cmpi ne, %10, %c0_i32_9 : i32
    scf.if %11 {
      %c0_10 = arith.constant 0 : index
      %c0_11 = arith.constant 0 : index
      %12 = vector.load %arg5[%c0_10, %c0_11] : memref<8x1xf32, #tpu.memory_space<vmem>>, vector<8x1xf32>
      %c0_12 = arith.constant 0 : index
      %c0_13 = arith.constant 0 : index
      %13 = vector.load %arg6[%c0_12, %c0_13] : memref<1x128xf32, #tpu.memory_space<vmem>>, vector<1x128xf32>
      %14 = vector.broadcast %12 : vector<8x1xf32> to vector<8x128xf32>
      %15 = vector.broadcast %13 : vector<1x128xf32> to vector<8x128xf32>
      %16 = arith.mulf %14, %15 : vector<8x128xf32>
      %cst_14 = arith.constant 9.99999993E-9 : f32
      %17 = vector.broadcast %cst_14 : f32 to vector<8x128xf32>
      %18 = arith.addf %16, %17 : vector<8x128xf32>
      %19 = tpu.reciprocal %18 {approx = true} : vector<8x128xf32> -> vector<8x128xf32>
      %c0_15 = arith.constant 0 : index
      %c0_16 = arith.constant 0 : index
      %20 = vector.load %arg8[%c0_15, %c0_16] : memref<8x128xf32, #tpu.memory_space<vmem>>, vector<8x128xf32>
      %21 = arith.mulf %20, %19 : vector<8x128xf32>
      %c0_17 = arith.constant 0 : index
      %c0_18 = arith.constant 0 : index
      %22 = vector.load %arg7[%c0_17, %c0_18] : memref<8x128xf32, #tpu.memory_space<vmem>>, vector<8x128xf32>
      tpu.vector_store %arg7[%c0_17, %c0_18], %21 {strides = array<i32>} : memref<8x128xf32, #tpu.memory_space<vmem>>, vector<8x128xf32>,
    } else {
    }
    return
  }
  func.func @transform_0(%arg0: i32, %arg1: i32, %arg2: i32) -> (i32, i32) {
    %c0_i32 = arith.constant 0 : i32
    return %arg0, %arg2 : i32, i32
  }
  func.func @transform_1(%arg0: i32, %arg1: i32, %arg2: i32) -> (i32, i32) {
    %c0_i32 = arith.constant 0 : i32
    return %arg1, %arg2 : i32, i32
  }
  func.func @transform_2(%arg0: i32, %arg1: i32, %arg2: i32) -> (i32, i32) {
    %c0_i32 = arith.constant 0 : i32
    %c0_i32_0 = arith.constant 0 : i32
    return %arg0, %c0_i32 : i32, i32
  }
  func.func @transform_3(%arg0: i32, %arg1: i32, %arg2: i32) -> (i32, i32) {
    %c0_i32 = arith.constant 0 : i32
    %c0_i32_0 = arith.constant 0 : i32
    return %c0_i32, %arg1 : i32, i32
  }
  func.func @transform_4(%arg0: i32, %arg1: i32, %arg2: i32) -> (i32, i32) {
    %c0_i32 = arith.constant 0 : i32
    return %arg0, %arg1 : i32, i32
  }
}

</mosaic_0001>

<bundles_post_ra>
// kernel: tpu_custom_call.1
= control target key start
LH: loop header
LB: loop body
LE: loop exit
PB: predicated region body
PF: predicated region fallthrough
CT: control target
= control target key end

     0   :  { %9 = vsyncpa [#allocation4], 0  ;;  %s628_s0 = inlined_call_operand.hbm [shape: f32[8,1024], index: 0, kind: input, shape index: {}]   ;;  %s629_s1 = inlined_call_operand.hbm [shape: f32[128,1024], index: 1, kind: input, shape index: {}]   ;;  %s630_s2 = inlined_call_operand.vmem [shape: f32[8,1], index: 2, kind: input, shape index: {}]   ;;  %s631_s3 = inlined_call_operand.vmem [shape: f32[1,128], index: 3, kind: input, shape index: {}]   ;;  %s632_s4 = inlined_call_operand.hbm [shape: f32[8,128], index: 4, kind: output, shape index: {}]  }
   0x1   :  { %10 = vsyncpa [#allocation7], 0 }
   0x2   :  { %11 = vsyncpa [#allocation5], 0  ;;  %s582_s15 = smov [#allocation3]   ;;  %s583_s17 = smov [#allocation6]  }
   0x3   :  { %s18_s16 = sshll.u32 %s582_s15, 4  ;;  %s27_s18 = sshll.u32 %s583_s17, 4  ;;  %s19_s16 = int_to_ptr.vmem [resolvable:$true] %s18_s16  ;;  %s28_s18 = int_to_ptr.vmem [resolvable:$true] %s27_s18 }
   0x4   :  { %s524_s19 = scalar_lea.vmem %s19_s16, 1024  ;;  %p529_p1 = scmp.lt.s32.totalorder %s19_s16, %s19_s16 }
   0x5   :  { %p525_p0 = scmp.ne.s32.totalorder %s19_s16, %s524_s19  ;;  %p530_p2 = scmp.lt.s32.totalorder %s524_s19, %s524_s19 }
   0x7   :  { %p531_p3 = por %p530_p2, %p529_p1 }
   0x9   :  { %p532_p4 = pnand %p531_p3, %p525_p0 }
   0xb   :  { %535 = shalt.err (!%p532_p4)
}
   0xc   :  { %21 = dma.hbm_to_vmem [thread:$0]  %s628_s0, 1024, %s19_s16, [#allocation4]  }
   0xd   :  { %s544_s22 = scalar_lea.vmem %s28_s18, 16384  ;;  %p549_p6 = scmp.lt.s32.totalorder %s28_s18, %s28_s18 }
   0xe   :  { %p545_p5 = scmp.ne.s32.totalorder %s28_s18, %s544_s22  ;;  %p550_p7 = scmp.lt.s32.totalorder %s544_s22, %s544_s22 }
  0x10   :  { %p551_p8 = por %p550_p7, %p549_p6 }
  0x12   :  { %p552_p9 = pnand %p551_p8, %p545_p5 }
  0x14   :  { %555 = shalt.err (!%p552_p9)
}
  0x15   :  { %s584_s23 = smov 1024   ;;  %s585_s24 = smov 64  }
  0x16   :  { %33 = dma.hbm_to_vmem [thread:$0]  %s629_s1, 16384, %s28_s18, [#allocation7], %s584_s23, %s584_s23, %s585_s24  }
  0x17   :  { %576 = dma.done.wait [#allocation4], 1024  }
  0x18   :  { %577 = vsyncadd [#allocation4], 4294966272 }
  0x19   :  { %578 = dma.done.wait [#allocation7], 16384  }
  0x1a   :  { %579 = vsyncadd [#allocation7], 4294950912  ;;  %v179_v0 = vld [vmem:[#allocation6 + $0x3c8] sm:$0xff]  ;;  %v181_v1 = vld [vmem:[#allocation6 + $0x3d8] sm:$0xff]  ;;  %v586_v10 = vmov 0   ;;  %s587_s28 = smov [#allocation8]  }
  0x1b   :  { %v178_v2 = vld [vmem:[#allocation6 + $0x3c0] sm:$0xff]  ;;  %186 = vmatprep.subr.mxu0 %v179_v0  ;;  %256 = vmatprep.subr.mxu1 %v181_v1  ;;  %v180_v3 = vld [vmem:[#allocation6 + $0x3d0] sm:$0xff]  ;;  %v171_v4 = vld [vmem:[#allocation6 + $0x388] sm:$0xff]  ;;  %s496_s29 = sshll.u32 %s587_s28, 4  ;;  %s497_s29 = int_to_ptr.vmem [resolvable:$true] %s496_s29 }
  0x1c   :  { %v173_v5 = vld [vmem:[#allocation6 + $0x398] sm:$0xff]  ;;  %187 = vmatpush1.xpose.msra.mxu0 %v178_v2  ;;  %257 = vmatpush1.xpose.msra.mxu1 %v180_v3  ;;  %v170_v6 = vld [vmem:[#allocation6 + $0x380] sm:$0xff]  ;;  %v172_v7 = vld [vmem:[#allocation6 + $0x390] sm:$0xff]  ;;  %s556_s30 = scalar_lea.vmem %s497_s29, 128  ;;  %p561_p11 = scmp.lt.s32.totalorder %s497_s29, %s497_s29 }
  0x1d   :  { %188 = vmatprep.subr.mxu0 %v171_v4  ;;  %258 = vmatprep.subr.mxu1 %v173_v5  ;;  %v163_v8 = vld [vmem:[#allocation6 + $0x348] sm:$0xff]  ;;  %v165_v9 = vld [vmem:[#allocation6 + $0x358] sm:$0xff]  ;;  %v162_v11 = vld [vmem:[#allocation6 + $0x340] sm:$0xff]  ;;  %p557_p10 = scmp.ne.s32.totalorder %s497_s29, %s556_s30  ;;  %p562_p12 = scmp.lt.s32.totalorder %s556_s30, %s556_s30 }
  0x1e   :  { %513 = vset.pattern.permute.xlu0 %v586_v10  ;;  %v164_v12 = vld [vmem:[#allocation6 + $0x350] sm:$0xff]  ;;  %v155_v13 = vld [vmem:[#allocation6 + $0x308] sm:$0xff]  ;;  %v157_v14 = vld [vmem:[#allocation6 + $0x318] sm:$0xff] }
  0x1f   :  { %v154_v15 = vld [vmem:[#allocation6 + $0x300] sm:$0xff]  ;;  %v156_v16 = vld [vmem:[#allocation6 + $0x310] sm:$0xff]  ;;  %v147_v17 = vld [vmem:[#allocation6 + $0x2c8] sm:$0xff]  ;;  %p563_p13 = por %p562_p12, %p561_p11 }
  0x20   :  { %189 = vmatpush1.xpose.msra.mxu0 %v170_v6  ;;  %259 = vmatpush1.xpose.msra.mxu1 %v172_v7  ;;  %v149_v18 = vld [vmem:[#allocation6 + $0x2d8] sm:$0xff]  ;;  %v146_v19 = vld [vmem:[#allocation6 + $0x2c0] sm:$0xff]  ;;  %v148_v20 = vld [vmem:[#allocation6 + $0x2d0] sm:$0xff] }
  0x21   :  { %190 = vmatprep.subr.mxu0 %v163_v8  ;;  %260 = vmatprep.subr.mxu1 %v165_v9  ;;  %v139_v21 = vld [vmem:[#allocation6 + $0x288] sm:$0xff]  ;;  %v141_v22 = vld [vmem:[#allocation6 + $0x298] sm:$0xff]  ;;  %v138_v23 = vld [vmem:[#allocation6 + $0x280] sm:$0xff]  ;;  %p564_p0 = pnand %p563_p13, %p557_p10 }
  0x22   :  { %v140_v24 = vld [vmem:[#allocation6 + $0x290] sm:$0xff]  ;;  %v131_v25 = vld [vmem:[#allocation6 + $0x248] sm:$0xff]  ;;  %v133_v26 = vld [vmem:[#allocation6 + $0x258] sm:$0xff] }
  0x23   :  { %v51_v27 = vld [vmem:[#allocation3 + $0x8] sm:$0xff]  ;;  %v53_v28 = vld [vmem:[#allocation3 + $0x18] sm:$0xff]  ;;  %v130_v29 = vld [vmem:[#allocation6 + $0x240] sm:$0xff] }
  0x24   :  { %191 = vmatpush1.xpose.msra.mxu0 %v162_v11  ;;  %261 = vmatpush1.xpose.msra.mxu1 %v164_v12  ;;  %v132_v30 = vld [vmem:[#allocation6 + $0x250] sm:$0xff]  ;;  %v123_v31 = vld [vmem:[#allocation6 + $0x208] sm:$0xff]  ;;  %v125_v32 = vld [vmem:[#allocation6 + $0x218] sm:$0xff] }
  0x25   :  { %192 = vmatprep.subr.mxu0 %v155_v13  ;;  %262 = vmatprep.subr.mxu1 %v157_v14  ;;  %v122_v33 = vld [vmem:[#allocation6 + $0x200] sm:$0xff]  ;;  %v124_v34 = vld [vmem:[#allocation6 + $0x210] sm:$0xff]  ;;  %v115_v35 = vld [vmem:[#allocation6 + $0x1c8] sm:$0xff] }
  0x26   :  { %250 = vmatprep.mubr.f32.mxu0 %v51_v27  ;;  %320 = vmatprep.mubr.f32.mxu1 %v53_v28  ;;  %v117_v36 = vld [vmem:[#allocation6 + $0x1d8] sm:$0xff]  ;;  %v114_v37 = vld [vmem:[#allocation6 + $0x1c0] sm:$0xff]  ;;  %v116_v38 = vld [vmem:[#allocation6 + $0x1d0] sm:$0xff] }
  0x27   :  { %v107_v39 = vld [vmem:[#allocation6 + $0x188] sm:$0xff]  ;;  %v109_v40 = vld [vmem:[#allocation6 + $0x198] sm:$0xff]  ;;  %v106_v41 = vld [vmem:[#allocation6 + $0x180] sm:$0xff] }
  0x28   :  { %193 = vmatpush1.xpose.msra.mxu0 %v154_v15  ;;  %263 = vmatpush1.xpose.msra.mxu1 %v156_v16  ;;  %v108_v42 = vld [vmem:[#allocation6 + $0x190] sm:$0xff]  ;;  %v99_v43 = vld [vmem:[#allocation6 + $0x148] sm:$0xff]  ;;  %v101_v44 = vld [vmem:[#allocation6 + $0x158] sm:$0xff] }
  0x29   :  { %194 = vmatprep.subr.mxu0 %v147_v17  ;;  %264 = vmatprep.subr.mxu1 %v149_v18  ;;  %v98_v45 = vld [vmem:[#allocation6 + $0x140] sm:$0xff]  ;;  %v100_v46 = vld [vmem:[#allocation6 + $0x150] sm:$0xff]  ;;  %v91_v47 = vld [vmem:[#allocation6 + $0x108] sm:$0xff] }
  0x2a   :  { %v93_v48 = vld [vmem:[#allocation6 + $0x118] sm:$0xff]  ;;  %v90_v49 = vld [vmem:[#allocation6 + $0x100] sm:$0xff]  ;;  %v92_v50 = vld [vmem:[#allocation6 + $0x110] sm:$0xff] }
  0x2b   :  { %v83_v51 = vld [vmem:[#allocation6 + $0xc8] sm:$0xff]  ;;  %v85_v52 = vld [vmem:[#allocation6 + $0xd8] sm:$0xff]  ;;  %v471_v53 = vld [vmem:[%s630_s2] sm:$0xff] }
  0x2c   :  { %195 = vmatpush1.xpose.msra.mxu0 %v146_v19  ;;  %265 = vmatpush1.xpose.msra.mxu1 %v148_v20  ;;  %v82_v54 = vld [vmem:[#allocation6 + $0xc0] sm:$0xff]  ;;  %v84_v55 = vld [vmem:[#allocation6 + $0xd0] sm:$0xff]  ;;  %v75_v56 = vld [vmem:[#allocation6 + $0x88] sm:$0xff] }
  0x2d   :  { %196 = vmatprep.subr.mxu0 %v139_v21  ;;  %266 = vmatprep.subr.mxu1 %v141_v22  ;;  %v77_v57 = vld [vmem:[#allocation6 + $0x98] sm:$0xff]  ;;  %v74_v58 = vld [vmem:[#allocation6 + $0x80] sm:$0xff]  ;;  %v76_v59 = vld [vmem:[#allocation6 + $0x90] sm:$0xff] }
  0x2e   :  { %475 = vperm.xlu0 %513, %v471_v53   ;;  %v67_v60 = vld [vmem:[#allocation6 + $0x48] sm:$0xff]  ;;  %v69_v61 = vld [vmem:[#allocation6 + $0x58] sm:$0xff]  ;;  %v66_v62 = vld [vmem:[#allocation6 + $0x40] sm:$0xff] }
  0x2f   :  { %v68_v63 = vld [vmem:[#allocation6 + $0x50] sm:$0xff]  ;;  %v59_v0 = vld [vmem:[#allocation6 + $0x8] sm:$0xff]  ;;  %v61_v1 = vld [vmem:[#allocation6 + $0x18] sm:$0xff] }
  0x30   :  { %197 = vmatpush1.xpose.msra.mxu0 %v138_v23  ;;  %267 = vmatpush1.xpose.msra.mxu1 %v140_v24  ;;  %v58_v2 = vld [vmem:[#allocation6] sm:$0xff]  ;;  %v60_v3 = vld [vmem:[#allocation6 + $0x10] sm:$0xff]  ;;  %v183_v4 = vld [vmem:[#allocation6 + $0x3e8] sm:$0xff] }
  0x31   :  { %198 = vmatprep.subr.mxu0 %v131_v25  ;;  %268 = vmatprep.subr.mxu1 %v133_v26  ;;  %v185_v5 = vld [vmem:[#allocation6 + $0x3f8] sm:$0xff]  ;;  %v50_v6 = vld [vmem:[#allocation3] sm:$0xff]  ;;  %v52_v7 = vld [vmem:[#allocation3 + $0x10] sm:$0xff] }
  0x32   :  { %v182_v8 = vld [vmem:[#allocation6 + $0x3e0] sm:$0xff]  ;;  %v184_v9 = vld [vmem:[#allocation6 + $0x3f0] sm:$0xff]  ;;  %v175_v10 = vld [vmem:[#allocation6 + $0x3a8] sm:$0xff] }
  0x33   :  { %v177_v11 = vld [vmem:[#allocation6 + $0x3b8] sm:$0xff]  ;;  %v55_v12 = vld [vmem:[#allocation3 + $0x28] sm:$0xff]  ;;  %v174_v14 = vld [vmem:[#allocation6 + $0x3a0] sm:$0xff] }
  0x34   :  { %199 = vmatpush1.xpose.msra.mxu0 %v130_v29  ;;  %269 = vmatpush1.xpose.msra.mxu1 %v132_v30  ;;  %v57_v13 = vld [vmem:[#allocation3 + $0x38] sm:$0xff]  ;;  %v176_v15 = vld [vmem:[#allocation6 + $0x3b0] sm:$0xff]  ;;  %v167_v16 = vld [vmem:[#allocation6 + $0x368] sm:$0xff] }
  0x35   :  { %200 = vmatprep.subr.mxu0 %v123_v31  ;;  %270 = vmatprep.subr.mxu1 %v125_v32  ;;  %v169_v17 = vld [vmem:[#allocation6 + $0x378] sm:$0xff]  ;;  %v166_v18 = vld [vmem:[#allocation6 + $0x360] sm:$0xff]  ;;  %v168_v19 = vld [vmem:[#allocation6 + $0x370] sm:$0xff] }
  0x36   :  { %v159_v20 = vld [vmem:[#allocation6 + $0x328] sm:$0xff]  ;;  %v161_v21 = vld [vmem:[#allocation6 + $0x338] sm:$0xff]  ;;  %v158_v22 = vld [vmem:[#allocation6 + $0x320] sm:$0xff] }
  0x37   :  { %v160_v23 = vld [vmem:[#allocation6 + $0x330] sm:$0xff]  ;;  %v151_v24 = vld [vmem:[#allocation6 + $0x2e8] sm:$0xff]  ;;  %v153_v25 = vld [vmem:[#allocation6 + $0x2f8] sm:$0xff] }
  0x38   :  { %201 = vmatpush1.xpose.msra.mxu0 %v122_v33  ;;  %271 = vmatpush1.xpose.msra.mxu1 %v124_v34  ;;  %v150_v26 = vld [vmem:[#allocation6 + $0x2e0] sm:$0xff]  ;;  %v152_v27 = vld [vmem:[#allocation6 + $0x2f0] sm:$0xff]  ;;  %v143_v28 = vld [vmem:[#allocation6 + $0x2a8] sm:$0xff] }
  0x39   :  { %202 = vmatprep.subr.mxu0 %v115_v35  ;;  %272 = vmatprep.subr.mxu1 %v117_v36  ;;  %v145_v29 = vld [vmem:[#allocation6 + $0x2b8] sm:$0xff]  ;;  %v142_v30 = vld [vmem:[#allocation6 + $0x2a0] sm:$0xff]  ;;  %v144_v31 = vld [vmem:[#allocation6 + $0x2b0] sm:$0xff] }
  0x3a   :  { %v135_v32 = vld [vmem:[#allocation6 + $0x268] sm:$0xff]  ;;  %v137_v33 = vld [vmem:[#allocation6 + $0x278] sm:$0xff]  ;;  %v134_v34 = vld [vmem:[#allocation6 + $0x260] sm:$0xff] }
  0x3b   :  { %v136_v35 = vld [vmem:[#allocation6 + $0x270] sm:$0xff]  ;;  %v127_v36 = vld [vmem:[#allocation6 + $0x228] sm:$0xff]  ;;  %v97_v53 = vld [vmem:[#allocation6 + $0x138] sm:$0xff] }
  0x3c   :  { %203 = vmatpush1.xpose.msra.mxu0 %v114_v37  ;;  %273 = vmatpush1.xpose.msra.mxu1 %v116_v38  ;;  %v129_v37 = vld [vmem:[#allocation6 + $0x238] sm:$0xff]  ;;  %v126_v38 = vld [vmem:[#allocation6 + $0x220] sm:$0xff] }
  0x3d   :  { %204 = vmatprep.subr.mxu0 %v107_v39  ;;  %274 = vmatprep.subr.mxu1 %v109_v40  ;;  %v128_v39 = vld [vmem:[#allocation6 + $0x230] sm:$0xff]  ;;  %v119_v40 = vld [vmem:[#allocation6 + $0x1e8] sm:$0xff] }
  0x40   :  { %205 = vmatpush1.xpose.msra.mxu0 %v106_v41  ;;  %275 = vmatpush1.xpose.msra.mxu1 %v108_v42  ;;  %v121_v41 = vld [vmem:[#allocation6 + $0x1f8] sm:$0xff]  ;;  %v118_v42 = vld [vmem:[#allocation6 + $0x1e0] sm:$0xff] }
  0x41   :  { %206 = vmatprep.subr.mxu0 %v99_v43  ;;  %276 = vmatprep.subr.mxu1 %v101_v44  ;;  %v120_v43 = vld [vmem:[#allocation6 + $0x1f0] sm:$0xff]  ;;  %v111_v44 = vld [vmem:[#allocation6 + $0x1a8] sm:$0xff] }
  0x44   :  { %207 = vmatpush1.xpose.msra.mxu0 %v98_v45  ;;  %277 = vmatpush1.xpose.msra.mxu1 %v100_v46  ;;  %v113_v45 = vld [vmem:[#allocation6 + $0x1b8] sm:$0xff]  ;;  %v110_v46 = vld [vmem:[#allocation6 + $0x1a0] sm:$0xff] }
  0x45   :  { %208 = vmatprep.subr.mxu0 %v91_v47  ;;  %278 = vmatprep.subr.mxu1 %v93_v48  ;;  %v112_v47 = vld [vmem:[#allocation6 + $0x1b0] sm:$0xff]  ;;  %v103_v48 = vld [vmem:[#allocation6 + $0x168] sm:$0xff] }
  0x48   :  { %209 = vmatpush1.xpose.msra.mxu0 %v90_v49  ;;  %279 = vmatpush1.xpose.msra.mxu1 %v92_v50  ;;  %v105_v49 = vld [vmem:[#allocation6 + $0x178] sm:$0xff]  ;;  %v102_v50 = vld [vmem:[#allocation6 + $0x160] sm:$0xff] }
  0x49   :  { %210 = vmatprep.subr.mxu0 %v83_v51  ;;  %280 = vmatprep.subr.mxu1 %v85_v52  ;;  %v104_v51 = vld [vmem:[#allocation6 + $0x170] sm:$0xff]  ;;  %v95_v52 = vld [vmem:[#allocation6 + $0x128] sm:$0xff] }
  0x4c   :  { %211 = vmatpush1.xpose.msra.mxu0 %v82_v54  ;;  %281 = vmatpush1.xpose.msra.mxu1 %v84_v55  ;;  %v94_v54 = vld [vmem:[#allocation6 + $0x120] sm:$0xff]  ;;  %v96_v55 = vld [vmem:[#allocation6 + $0x130] sm:$0xff] }
  0x4d   :  { %212 = vmatprep.subr.mxu0 %v75_v56  ;;  %282 = vmatprep.subr.mxu1 %v77_v57  ;;  %v87_v56 = vld [vmem:[#allocation6 + $0xe8] sm:$0xff]  ;;  %v89_v57 = vld [vmem:[#allocation6 + $0xf8] sm:$0xff] }
  0x50   :  { %213 = vmatpush1.xpose.msra.mxu0 %v74_v58  ;;  %283 = vmatpush1.xpose.msra.mxu1 %v76_v59  ;;  %v86_v58 = vld [vmem:[#allocation6 + $0xe0] sm:$0xff]  ;;  %v88_v59 = vld [vmem:[#allocation6 + $0xf0] sm:$0xff] }
  0x51   :  { %214 = vmatprep.subr.mxu0 %v67_v60  ;;  %284 = vmatprep.subr.mxu1 %v69_v61  ;;  %v79_v60 = vld [vmem:[#allocation6 + $0xa8] sm:$0xff]  ;;  %v81_v61 = vld [vmem:[#allocation6 + $0xb8] sm:$0xff] }
  0x54   :  { %215 = vmatpush1.xpose.msra.mxu0 %v66_v62  ;;  %285 = vmatpush1.xpose.msra.mxu1 %v68_v63  ;;  %v78_v62 = vld [vmem:[#allocation6 + $0xa0] sm:$0xff]  ;;  %v80_v63 = vld [vmem:[#allocation6 + $0xb0] sm:$0xff] }
  0x55   :  { %216 = vmatprep.subr.mxu0 %v59_v0  ;;  %286 = vmatprep.subr.mxu1 %v61_v1  ;;  %v71_v0 = vld [vmem:[#allocation6 + $0x68] sm:$0xff]  ;;  %v73_v1 = vld [vmem:[#allocation6 + $0x78] sm:$0xff] }
  0x58   :  { %217 = vmatpush1.xpose.msra.mxu0 %v58_v2  ;;  %287 = vmatpush1.xpose.msra.mxu1 %v60_v3  ;;  %v70_v2 = vld [vmem:[#allocation6 + $0x60] sm:$0xff]  ;;  %v72_v3 = vld [vmem:[#allocation6 + $0x70] sm:$0xff] }
  0x59   :  { %326 = vmatprep.subr.mxu0 %v183_v4  ;;  %396 = vmatprep.subr.mxu1 %v185_v5  ;;  %v63_v4 = vld [vmem:[#allocation6 + $0x28] sm:$0xff]  ;;  %v65_v5 = vld [vmem:[#allocation6 + $0x38] sm:$0xff] }
  0x5b   :  { %251 = vmatmul.mubr.f32.vlgmr.msra.gmra.mxu0 %v50_v6  ;;  %321 = vmatmul.mubr.f32.vlgmr.msra.gmra.mxu1 %v52_v7  ;;  %v62_v6 = vld [vmem:[#allocation6 + $0x20] sm:$0xff]  ;;  %v64_v7 = vld [vmem:[#allocation6 + $0x30] sm:$0xff] }
  0x5c   :  { %327 = vmatpush1.xpose.msra.mxu0 %v182_v8  ;;  %397 = vmatpush1.xpose.msra.mxu1 %v184_v9  ;;  %v54_v8 = vld [vmem:[#allocation3 + $0x20] sm:$0xff]  ;;  %v56_v9 = vld [vmem:[#allocation3 + $0x30] sm:$0xff] }
  0x5d   :  { %328 = vmatprep.subr.mxu0 %v175_v10  ;;  %398 = vmatprep.subr.mxu1 %v177_v11 }
  0x5e   :  { %390 = vmatprep.mubr.f32.mxu0 %v55_v12  ;;  %460 = vmatprep.mubr.f32.mxu1 %v57_v13 }
  0x60   :  { %329 = vmatpush1.xpose.msra.mxu0 %v174_v14  ;;  %399 = vmatpush1.xpose.msra.mxu1 %v176_v15  ;;  %v506_v14 = vld [vmem:[%s631_s3] ss:$0 sm:$0xff] }
  0x61   :  { %330 = vmatprep.subr.mxu0 %v167_v16  ;;  %400 = vmatprep.subr.mxu1 %v169_v17 }
  0x64   :  { %331 = vmatpush1.xpose.msra.mxu0 %v166_v18  ;;  %401 = vmatpush1.xpose.msra.mxu1 %v168_v19 }
  0x65   :  { %332 = vmatprep.subr.mxu0 %v159_v20  ;;  %402 = vmatprep.subr.mxu1 %v161_v21 }
  0x68   :  { %333 = vmatpush1.xpose.msra.mxu0 %v158_v22  ;;  %403 = vmatpush1.xpose.msra.mxu1 %v160_v23 }
  0x69   :  { %334 = vmatprep.subr.mxu0 %v151_v24  ;;  %404 = vmatprep.subr.mxu1 %v153_v25 }
  0x6c   :  { %335 = vmatpush1.xpose.msra.mxu0 %v150_v26  ;;  %405 = vmatpush1.xpose.msra.mxu1 %v152_v27 }
  0x6d   :  { %336 = vmatprep.subr.mxu0 %v143_v28  ;;  %406 = vmatprep.subr.mxu1 %v145_v29 }
  0x70   :  { %337 = vmatpush1.xpose.msra.mxu0 %v142_v30  ;;  %407 = vmatpush1.xpose.msra.mxu1 %v144_v31 }
  0x71   :  { %338 = vmatprep.subr.mxu0 %v135_v32  ;;  %408 = vmatprep.subr.mxu1 %v137_v33 }
  0x74   :  { %339 = vmatpush1.xpose.msra.mxu0 %v134_v34  ;;  %409 = vmatpush1.xpose.msra.mxu1 %v136_v35 }
  0x75   :  { %340 = vmatprep.subr.mxu0 %v127_v36  ;;  %410 = vmatprep.subr.mxu1 %v129_v37 }
  0x78   :  { %341 = vmatpush1.xpose.msra.mxu0 %v126_v38  ;;  %411 = vmatpush1.xpose.msra.mxu1 %v128_v39 }
  0x79   :  { %342 = vmatprep.subr.mxu0 %v119_v40  ;;  %412 = vmatprep.subr.mxu1 %v121_v41 }
  0x7c   :  { %343 = vmatpush1.xpose.msra.mxu0 %v118_v42  ;;  %413 = vmatpush1.xpose.msra.mxu1 %v120_v43 }
  0x7d   :  { %344 = vmatprep.subr.mxu0 %v111_v44  ;;  %414 = vmatprep.subr.mxu1 %v113_v45 }
  0x80   :  { %345 = vmatpush1.xpose.msra.mxu0 %v110_v46  ;;  %415 = vmatpush1.xpose.msra.mxu1 %v112_v47 }
  0x81   :  { %346 = vmatprep.subr.mxu0 %v103_v48  ;;  %416 = vmatprep.subr.mxu1 %v105_v49 }
  0x84   :  { %347 = vmatpush1.xpose.msra.mxu0 %v102_v50  ;;  %417 = vmatpush1.xpose.msra.mxu1 %v104_v51 }
  0x85   :  { %348 = vmatprep.subr.mxu0 %v95_v52  ;;  %418 = vmatprep.subr.mxu1 %v97_v53 }
  0x88   :  { %349 = vmatpush1.xpose.msra.mxu0 %v94_v54  ;;  %419 = vmatpush1.xpose.msra.mxu1 %v96_v55 }
  0x89   :  { %350 = vmatprep.subr.mxu0 %v87_v56  ;;  %420 = vmatprep.subr.mxu1 %v89_v57 }
  0x8c   :  { %351 = vmatpush1.xpose.msra.mxu0 %v86_v58  ;;  %421 = vmatpush1.xpose.msra.mxu1 %v88_v59 }
  0x8d   :  { %352 = vmatprep.subr.mxu0 %v79_v60  ;;  %422 = vmatprep.subr.mxu1 %v81_v61 }
  0x90   :  { %353 = vmatpush1.xpose.msra.mxu0 %v78_v62  ;;  %423 = vmatpush1.xpose.msra.mxu1 %v80_v63 }
  0x91   :  { %354 = vmatprep.subr.mxu0 %v71_v0  ;;  %424 = vmatprep.subr.mxu1 %v73_v1 }
  0x94   :  { %355 = vmatpush1.xpose.msra.mxu0 %v70_v2  ;;  %425 = vmatpush1.xpose.msra.mxu1 %v72_v3 }
  0x95   :  { %356 = vmatprep.subr.mxu0 %v63_v4  ;;  %426 = vmatprep.subr.mxu1 %v65_v5 }
  0x98   :  { %357 = vmatpush1.xpose.msra.mxu0 %v62_v6  ;;  %427 = vmatpush1.xpose.msra.mxu1 %v64_v7 }
  0x9b   :  { %391 = vmatmul.mubr.f32.vlgmr.msra.gmra.mxu0 %v54_v8  ;;  %461 = vmatmul.mubr.f32.vlgmr.msra.gmra.mxu1 %v56_v9 }
  0xa9   :  { %v476_v15 = vpop.permute.xlu0 %475 }
  0xaa   :  { %v484_v16 = vmul.f32 %v506_v14, %v476_v15 }
  0xac   :  { %v485_v17 = vadd.f32 1e-08, %v484_v16 }
  0xae   :  { %514 = vrcp.f32 %v485_v17 }
  0xbb   :  { %v515_v22 = vpop.eup %514 }
 0x11b   :  { %v252_v10 = vpop.f32.mrf.mxu0  ;;  %v322_v11 = vpop.f32.mrf.mxu1 }
 0x11c   :  { %v323_v18 = vadd.f32 %v322_v11, %v252_v10 }
 0x11d   :  { %v254_v12 = vpop.f32.mrf.mxu0  ;;  %v324_v13 = vpop.f32.mrf.mxu1 }
 0x15b   :  { %v392_v19 = vpop.f32.mrf.mxu0  ;;  %v462_v20 = vpop.f32.mrf.mxu1 }
 0x15c   :  { %v393_v21 = vadd.f32 %v392_v19, %v323_v18 }
 0x15d   :  { %v394_v23 = vpop.f32.mrf.mxu0  ;;  %v464_v24 = vpop.f32.mrf.mxu1 }
 0x15e   :  { %v463_v25 = vadd.f32 %v462_v20, %v393_v21 }
 0x160   :  { %v488_v26 = vmul.f32 %v515_v22, %v463_v25 }
 0x162   :  { %489 = vst [vmem:[#allocation8] sm:$0xff] %v488_v26 }
 0x163   :  { %567 = shalt.err (!%p564_p0)
}
 0x164   :  { %499 = dma.vmem_to_hbm [thread:$0]  %s497_s29, 128, %s632_s4, [#allocation5]  }
 0x165   :  { %580 = dma.done.wait [#allocation5], 128  }
 0x166   :  { %581 = vsyncadd [#allocation5], 4294967168 }
 0x167   :  { %503 = vsyncpa [#allocation4], 1 }
 0x168   :  { %504 = vsyncpa [#allocation7], 1 }
 0x169   :  { %505 = vsyncpa [#allocation5], 1 }

</bundles_post_ra>
